<compile_context>
chip_gen: v7x
topology: tpu7x:2x2x1
jax: 0.10.0
libtpu: 0.0.40
codegen_flags: <defaults>
</compile_context>

<pallas_src>
import functools

import jax
import jax.numpy as jnp
from jax.experimental import pallas as pl
from jax.experimental.pallas import tpu as pltpu

BN_EPS = 1e-5
LANE = 128
SUBLANE = 8
NEG_INF = -1e30          # fill for padded class columns of bc3
SINGLE_TILE_MAX = 1024   # single-tile (inline stats) path up to this batch
MULTI_TB = 512           # batch tile for the phased path (multiple of 128)


def _round_up(n, m):
    return ((n + m - 1) // m) * m


def _pad2d(a, rows, cols, value=0.0):
    r, c = a.shape
    return jnp.pad(a, ((0, rows - r), (0, cols - c)), constant_values=value)


# -----------------------------------------------------------------------------
# Shared classifier tail: Linear+ReLU, Linear+ReLU, Linear, softmax.
# bf16 operands on the MXU, f32 accumulation; padded class columns carry a
# -1e30 bias so they vanish in the softmax without any masking.
# -----------------------------------------------------------------------------
def _classifier_tail(h, wc1, bc1, wc2, bc2, wc3, bc3):
    c = jnp.dot(h.astype(jnp.bfloat16), wc1,
                preferred_element_type=jnp.float32) + bc1
    c = jnp.maximum(c, 0.0)
    c = jnp.dot(c.astype(jnp.bfloat16), wc2,
                preferred_element_type=jnp.float32) + bc2
    c = jnp.maximum(c, 0.0)
    logits = jnp.dot(c.astype(jnp.bfloat16), wc3,
                     preferred_element_type=jnp.float32) + bc3
    m = jnp.max(logits, axis=-1, keepdims=True)
    e = jnp.exp(logits - m)
    return e / jnp.sum(e, axis=-1, keepdims=True)   # exact normalisation


# -----------------------------------------------------------------------------
# Fused single-tile kernel (B <= SINGLE_TILE_MAX): the bottleneck activation
# stays in VMEM, BN stats are computed inline from it -> one bottleneck matmul.
# -----------------------------------------------------------------------------
def _fused_single_tile_kernel(x_ref, w1_ref, gamma_ref, beta_ref,
                              wc1_ref, bc1_ref, wc2_ref, bc2_ref,
                              wc3_ref, bc3_ref, out_ref, *, batch, rows):
    # bottleneck Linear(D -> 2D); b1 omitted (exact no-op under training BN)
    xb = x_ref[...].astype(jnp.bfloat16)
    h = jnp.dot(xb, w1_ref[...], preferred_element_type=jnp.float32)

    # full-batch BatchNorm statistics (biased variance, eps=1e-5)
    inv_n = jnp.float32(1.0 / batch)
    mean = jnp.sum(h, axis=0, keepdims=True) * inv_n
    d = h - mean
    if rows != batch:   # static: zero-padded batch rows must not contribute
        row = jax.lax.broadcasted_iota(jnp.int32, (rows, 1), 0)
        d = jnp.where(row < batch, d, 0.0)
    var = jnp.sum(d * d, axis=0, keepdims=True) * inv_n
    rstd = jax.lax.rsqrt(var + BN_EPS)

    # fused BN scale/shift + ReLU
    scale = rstd * gamma_ref[...]
    shift = beta_ref[...] - mean * scale
    hb = jnp.maximum(h * scale + shift, 0.0)

    out_ref[...] = _classifier_tail(hb, wc1_ref[...], bc1_ref[...],
                                    wc2_ref[...], bc2_ref[...],
                                    wc3_ref[...], bc3_ref[...])


# -----------------------------------------------------------------------------
# Fused phased kernel (large B): grid = (2, n_tiles), both axes "arbitrary".
#   phase 0: accumulate per-feature sum / sumsq across all batch tiles,
#            finalise (scale, shift) into VMEM scratch on the last tile.
#   phase 1: recompute the cheap bottleneck matmul per tile, apply BN + tail.
# -----------------------------------------------------------------------------
def _fused_phased_kernel(x_ref, w1_ref, gamma_ref, beta_ref,
                         wc1_ref, bc1_ref, wc2_ref, bc2_ref,
                         wc3_ref, bc3_ref, out_ref,
                         sum_ref, sq_ref, scale_ref, shift_ref, *, batch):
    phase = pl.program_id(0)
    j = pl.program_id(1)

    # bottleneck matmul; b1 dropped, so zero-padded x rows yield zero h rows
    # and contribute exactly zero to sum / sumsq (no masking needed).
    xb = x_ref[...].astype(jnp.bfloat16)
    h = jnp.dot(xb, w1_ref[...], preferred_element_type=jnp.float32)

    @pl.when(phase == 0)
    def _accumulate():
        @pl.when(j == 0)
        def _init():
            sum_ref[...] = jnp.zeros_like(sum_ref)
            sq_ref[...] = jnp.zeros_like(sq_ref)

        sum_ref[...] += jnp.sum(h, axis=0, keepdims=True)
        sq_ref[...] += jnp.sum(h * h, axis=0, keepdims=True)

        @pl.when(j == pl.num_programs(1) - 1)
        def _finalize():
            inv_n = jnp.float32(1.0 / batch)
            mean = sum_ref[...] * inv_n
            # TODO(synk): E[h^2]-E[h]^2 can cancel when |mean| >> std; fine
            # here (xavier weights, bottleneck bias removed before the stats).
            var = jnp.maximum(sq_ref[...] * inv_n - mean * mean, 0.0)
            rstd = jax.lax.rsqrt(var + BN_EPS)
            scale_ref[...] = rstd * gamma_ref[...]
            shift_ref[...] = beta_ref[...] - mean * scale_ref[...]

    @pl.when(phase == 1)
    def _apply():
        hb = jnp.maximum(h * scale_ref[...] + shift_ref[...], 0.0)
        out_ref[...] = _classifier_tail(hb, wc1_ref[...], bc1_ref[...],
                                        wc2_ref[...], bc2_ref[...],
                                        wc3_ref[...], bc3_ref[...])


# -----------------------------------------------------------------------------
# Host-side parameter preparation (once, outside the jitted forward).
# -----------------------------------------------------------------------------
def prepare_params(params):
    """Pad feature/class dims to the 128-lane width and cast matmul operands
    to bf16.  bc3's padded columns are filled with -1e30 so padded logits
    vanish in the softmax.  b1 is dropped (no-op under training-mode BN)."""
    f32, bf16 = jnp.float32, jnp.bfloat16
    D, D2 = params["w1"].shape
    num_class = params["wc3"].shape[1]
    Dp = _round_up(D, LANE)
    D2p = _round_up(D2, LANE)
    Cp = _round_up(num_class, LANE)

    bc3 = _pad2d(params["bc3"].astype(f32).reshape(1, num_class), 1, Cp,
                 value=NEG_INF)
    return {
        "w1": _pad2d(params["w1"].astype(bf16), Dp, D2p),
        "gamma": _pad2d(params["gamma"].astype(f32), 1, D2p),
        "beta": _pad2d(params["beta"].astype(f32), 1, D2p),
        "wc1": _pad2d(params["wc1"].astype(bf16), D2p, Dp),
        "bc1": _pad2d(params["bc1"].astype(f32), 1, Dp),
        "wc2": _pad2d(params["wc2"].astype(bf16), Dp, Dp),
        "bc2": _pad2d(params["bc2"].astype(f32), 1, Dp),
        "wc3": _pad2d(params["wc3"].astype(bf16), Dp, Cp),
        "bc3": bc3,
    }


def _vmem_limit_bytes(TB, Dp, D2p, Cp):
    bf16, f32 = 2, 4
    weights = (Dp * D2p + D2p * Dp + Dp * Dp + Dp * Cp) * bf16
    vectors = (8 * D2p + 4 * Dp + 2 * Cp) * f32
    stream = 2 * TB * (Dp + Cp) * f32            # double-buffered x / out tiles
    interm = 6 * TB * max(D2p, Dp, Cp) * f32     # h, c, logits + temporaries
    need = 2 * weights + vectors + stream + interm + (4 << 20)
    # clamp to v7x's 64 MiB per-core physical VMEM (v5e/v6e have 128 MiB).
    return int(min(max(need, 32 << 20), 64 << 20))


# -----------------------------------------------------------------------------
# Forward wrapper.
# -----------------------------------------------------------------------------
def combined_classifier_forward(x, prepped, *, num_class):
    """x: (B, D) float32.  prepped: output of prepare_params (static weights)."""
    B, D = x.shape
    Dp, D2p = prepped["w1"].shape
    Cp = prepped["wc3"].shape[1]

    B8 = _round_up(B, SUBLANE)
    TB = B8 if B8 <= SINGLE_TILE_MAX else MULTI_TB
    Bp = _round_up(B, TB)
    n_tiles = Bp // TB

    # x stays f32 (cast to bf16 per tile inside the kernel); pad only if needed
    xp = x if (Bp, Dp) == (B, D) else jnp.pad(x, ((0, Bp - B), (0, Dp - D)))

    weight_ops = (prepped["w1"], prepped["gamma"], prepped["beta"],
                  prepped["wc1"], prepped["bc1"], prepped["wc2"],
                  prepped["bc2"], prepped["wc3"], prepped["bc3"])

    def _full(a):   # grid-invariant, VMEM-resident block
        return pl.BlockSpec(a.shape, lambda *_: (0,) * a.ndim)

    weight_specs = [_full(a) for a in weight_ops]
    vlim = _vmem_limit_bytes(TB, Dp, D2p, Cp)

    if n_tiles == 1:
        out_p = pl.pallas_call(
            functools.partial(_fused_single_tile_kernel, batch=B, rows=Bp),
            out_shape=jax.ShapeDtypeStruct((Bp, Cp), jnp.float32),
            grid=(1,),
            in_specs=[pl.BlockSpec((Bp, Dp), lambda i: (0, 0))] + weight_specs,
            out_specs=pl.BlockSpec((Bp, Cp), lambda i: (0, 0)),
            compiler_params=pltpu.CompilerParams(
                dimension_semantics=("arbitrary",),
                vmem_limit_bytes=vlim),
        )(xp, *weight_ops)
    else:
        # out index map (i*j, 0): stays on block 0 through phase 0 (nothing is
        # written, so no garbage writeback), then walks the tiles in phase 1.
        out_p = pl.pallas_call(
            functools.partial(_fused_phased_kernel, batch=B),
            out_shape=jax.ShapeDtypeStruct((Bp, Cp), jnp.float32),
            grid=(2, n_tiles),
            in_specs=[pl.BlockSpec((TB, Dp), lambda i, j: (j, 0))] + weight_specs,
            out_specs=pl.BlockSpec((TB, Cp), lambda i, j: (i * j, 0)),
            scratch_shapes=[pltpu.VMEM((1, D2p), jnp.float32)
                            for _ in range(4)],
            compiler_params=pltpu.CompilerParams(
                dimension_semantics=("arbitrary", "arbitrary"),
                vmem_limit_bytes=vlim),
        )(xp, *weight_ops)

    return out_p[:B, :num_class]


# -----------------------------------------------------------------------------
# Parameter init + references.
# -----------------------------------------------------------------------------
def init_params(key, transformer_dim, num_class):
    """xavier-normal weights, zero biases (matches the module's init)."""
    D = transformer_dim
    D2 = 2 * D

    def xavier(k, fan_in, fan_out):
        std = (2.0 / (fan_in + fan_out)) ** 0.5
        # stored as (in, out) = PyTorch weight.T
        return std * jax.random.normal(k, (fan_in, fan_out), dtype=jnp.float32)

    ks = jax.random.split(key, 4)
    return {
        "w1": xavier(ks[0], D, D2),
        "b1": jnp.zeros((1, D2), jnp.float32),
        "gamma": jnp.ones((1, D2), jnp.float32),
        "beta": jnp.zeros((1, D2), jnp.float32),
        "wc1": xavier(ks[1], D2, D),
        "bc1": jnp.zeros((1, D), jnp.float32),
        "wc2": xavier(ks[2], D, D),
        "bc2": jnp.zeros((1, D), jnp.float32),
        "wc3": xavier(ks[3], D, num_class),
        "bc3": jnp.zeros((1, num_class), jnp.float32),
    }


def _reference_forward(x, p):
    """Pure-JAX f32 reference (same math as the PyTorch module, training-mode BN)."""
    h = x @ p["w1"] + p["b1"]
    mean = jnp.mean(h, axis=0, keepdims=True)
    var = jnp.mean((h - mean) ** 2, axis=0, keepdims=True)
    h = jnp.maximum((h - mean) / jnp.sqrt(var + BN_EPS) * p["gamma"]
                    + p["beta"], 0.0)
    c = jnp.maximum(h @ p["wc1"] + p["bc1"], 0.0)
    c = jnp.maximum(c @ p["wc2"] + p["bc2"], 0.0)
    logits = c @ p["wc3"] + p["bc3"]
    return jax.nn.softmax(logits, axis=1)


def _reference_forward_bf16(x, p):
    """Reference with the kernel's quantization: bf16 weight AND activation
    operands for every matmul, f32 accumulation; BN / softmax in f32."""
    bf16 = jnp.bfloat16
    dot = lambda a, b: jnp.dot(a.astype(bf16), b.astype(bf16),
                               preferred_element_type=jnp.float32)
    h = dot(x, p["w1"]) + p["b1"]          # keeps b1 (kernel drops it: no-op)
    mean = jnp.mean(h, axis=0, keepdims=True)
    var = jnp.mean((h - mean) ** 2, axis=0, keepdims=True)
    h = jnp.maximum((h - mean) * jax.lax.rsqrt(var + BN_EPS) * p["gamma"]
                    + p["beta"], 0.0)
    c = jnp.maximum(dot(h, p["wc1"]) + p["bc1"], 0.0)
    c = jnp.maximum(dot(c, p["wc2"]) + p["bc2"], 0.0)
    logits = dot(c, p["wc3"]) + p["bc3"]
    return jax.nn.softmax(logits, axis=1)


if __name__ == "__main__":
    def run_case(key, B, transformer_dim, num_class):
        kx, kp, kb = jax.random.split(key, 3)
        x = jax.random.normal(kx, (B, transformer_dim), dtype=jnp.float32)
        params = init_params(kp, transformer_dim, num_class)
        # small nonzero bottleneck bias: the references keep it, the kernel
        # drops it -- matching outputs confirm it is a no-op under training BN.
        params["b1"] = 0.1 * jax.random.normal(
            kb, (1, 2 * transformer_dim), dtype=jnp.float32)

        prepped = prepare_params(params)
        fwd = jax.jit(functools.partial(combined_classifier_forward,
                                        num_class=num_class))
        out = jax.block_until_ready(fwd(x, prepped))

        assert out.shape == (B, num_class)
        ref_q = _reference_forward_bf16(x, params)   # same quantization: tight
        ref_f = _reference_forward(x, params)        # full precision: loose
        assert jnp.allclose(out, ref_q, atol=2e-3, rtol=2e-3), \
            float(jnp.max(jnp.abs(out - ref_q)))
        assert jnp.allclose(out, ref_f, atol=5e-2, rtol=5e-2), \
            float(jnp.max(jnp.abs(out - ref_f)))
        assert jnp.allclose(jnp.sum(out, axis=1), 1.0, atol=1e-4)

    key = jax.random.PRNGKey(0)
    k1, k2 = jax.random.split(key)
    run_case(k1, B=8, transformer_dim=32, num_class=3)      # single-tile path
    run_case(k2, B=1200, transformer_dim=32, num_class=3)   # phased multi-tile path
    print("KERNEL_OK")
</pallas_src>

<mosaic_0001>
module attributes {stable_mosaic.version = 11 : i64} {
  func.func @_fused_single_tile_kernel(%arg0: i32, %arg1: memref<8x128xf32, #tpu.memory_space<vmem>>, %arg2: memref<128x128xbf16, #tpu.memory_space<vmem>>, %arg3: memref<1x128xf32, #tpu.memory_space<vmem>>, %arg4: memref<1x128xf32, #tpu.memory_space<vmem>>, %arg5: memref<128x128xbf16, #tpu.memory_space<vmem>>, %arg6: memref<1x128xf32, #tpu.memory_space<vmem>>, %arg7: memref<128x128xbf16, #tpu.memory_space<vmem>>, %arg8: memref<1x128xf32, #tpu.memory_space<vmem>>, %arg9: memref<128x128xbf16, #tpu.memory_space<vmem>>, %arg10: memref<1x128xf32, #tpu.memory_space<vmem>>, %arg11: memref<8x128xf32, #tpu.memory_space<vmem>>) attributes {dimension_semantics = [#tpu.dimension_semantics<arbitrary>], iteration_bounds = array<i64: 1>, scalar_prefetch = 0 : i64, scratch_operands = 0 : i64, tpu.core_type = #tpu.core_type<tc>, window_params = [{pipeline_mode = #tpu.pipeline_mode<synchronous>, transform_indices = @transform_0, window_bounds = array<i64: 8, 128>}, {pipeline_mode = #tpu.pipeline_mode<synchronous>, transform_indices = @transform_1, window_bounds = array<i64: 128, 128>}, {pipeline_mode = #tpu.pipeline_mode<synchronous>, transform_indices = @transform_2, window_bounds = array<i64: 1, 128>}, {pipeline_mode = #tpu.pipeline_mode<synchronous>, transform_indices = @transform_3, window_bounds = array<i64: 1, 128>}, {pipeline_mode = #tpu.pipeline_mode<synchronous>, transform_indices = @transform_4, window_bounds = array<i64: 128, 128>}, {pipeline_mode = #tpu.pipeline_mode<synchronous>, transform_indices = @transform_5, window_bounds = array<i64: 1, 128>}, {pipeline_mode = #tpu.pipeline_mode<synchronous>, transform_indices = @transform_6, window_bounds = array<i64: 128, 128>}, {pipeline_mode = #tpu.pipeline_mode<synchronous>, transform_indices = @transform_7, window_bounds = array<i64: 1, 128>}, {pipeline_mode = #tpu.pipeline_mode<synchronous>, transform_indices = @transform_8, window_bounds = array<i64: 128, 128>}, {pipeline_mode = #tpu.pipeline_mode<synchronous>, transform_indices = @transform_9, window_bounds = array<i64: 1, 128>}, {pipeline_mode = #tpu.pipeline_mode<synchronous>, transform_indices = @transform_10, window_bounds = array<i64: 8, 128>}]} {
    %c0 = arith.constant 0 : index
    %c0_0 = arith.constant 0 : index
    %0 = vector.load %arg1[%c0, %c0_0] : memref<8x128xf32, #tpu.memory_space<vmem>>, vector<8x128xf32>
    %1 = arith.truncf %0 : vector<8x128xf32> to vector<8x128xbf16>
    %c0_1 = arith.constant 0 : index
    %c0_2 = arith.constant 0 : index
    %2 = vector.load %arg2[%c0_1, %c0_2] : memref<128x128xbf16, #tpu.memory_space<vmem>>, vector<128x128xbf16>
    %cst = arith.constant dense<0.000000e+00> : vector<8x128xf32>
    %3 = tpu.matmul %1, %2, %cst {dimension_numbers = #tpu.dot_dimension_numbers<[1], [0], [0], [1], [0, 0, 1, 1], [], []>} : vector<8x128xbf16>, vector<128x128xbf16>, vector<8x128xf32> -> vector<8x128xf32>
    %cst_3 = arith.constant dense<0.000000e+00> : vector<128xf32>
    %4 = vector.multi_reduction <add>, %3, %cst_3 [0] : vector<8x128xf32> to vector<128xf32>
    %5 = vector.shape_cast %4 : vector<128xf32> to vector<1x128xf32>
    %cst_4 = arith.constant 1.250000e-01 : f32
    %6 = vector.broadcast %cst_4 : f32 to vector<1x128xf32>
    %7 = arith.mulf %5, %6 : vector<1x128xf32>
    %8 = vector.broadcast %7 : vector<1x128xf32> to vector<8x128xf32>
    %9 = arith.subf %3, %8 : vector<8x128xf32>
    %10 = arith.mulf %9, %9 : vector<8x128xf32>
    %cst_5 = arith.constant dense<0.000000e+00> : vector<128xf32>
    %11 = vector.multi_reduction <add>, %10, %cst_5 [0] : vector<8x128xf32> to vector<128xf32>
    %12 = vector.shape_cast %11 : vector<128xf32> to vector<1x128xf32>
    %cst_6 = arith.constant 1.250000e-01 : f32
    %13 = vector.broadcast %cst_6 : f32 to vector<1x128xf32>
    %14 = arith.mulf %12, %13 : vector<1x128xf32>
    %cst_7 = arith.constant 9.99999974E-6 : f32
    %15 = vector.broadcast %cst_7 : f32 to vector<1x128xf32>
    %16 = arith.addf %14, %15 : vector<1x128xf32>
    %17 = math.rsqrt %16 : vector<1x128xf32>
    %c0_8 = arith.constant 0 : index
    %c0_9 = arith.constant 0 : index
    %18 = vector.load %arg3[%c0_8, %c0_9] : memref<1x128xf32, #tpu.memory_space<vmem>>, vector<1x128xf32>
    %19 = arith.mulf %17, %18 : vector<1x128xf32>
    %c0_10 = arith.constant 0 : index
    %c0_11 = arith.constant 0 : index
    %20 = vector.load %arg4[%c0_10, %c0_11] : memref<1x128xf32, #tpu.memory_space<vmem>>, vector<1x128xf32>
    %21 = arith.mulf %7, %19 : vector<1x128xf32>
    %22 = arith.subf %20, %21 : vector<1x128xf32>
    %23 = vector.broadcast %19 : vector<1x128xf32> to vector<8x128xf32>
    %24 = arith.mulf %3, %23 : vector<8x128xf32>
    %25 = vector.broadcast %22 : vector<1x128xf32> to vector<8x128xf32>
    %26 = arith.addf %24, %25 : vector<8x128xf32>
    %cst_12 = arith.constant 0.000000e+00 : f32
    %27 = vector.broadcast %cst_12 : f32 to vector<8x128xf32>
    %28 = arith.maximumf %26, %27 : vector<8x128xf32>
    %c0_13 = arith.constant 0 : index
    %c0_14 = arith.constant 0 : index
    %29 = vector.load %arg5[%c0_13, %c0_14] : memref<128x128xbf16, #tpu.memory_space<vmem>>, vector<128x128xbf16>
    %c0_15 = arith.constant 0 : index
    %c0_16 = arith.constant 0 : index
    %30 = vector.load %arg6[%c0_15, %c0_16] : memref<1x128xf32, #tpu.memory_space<vmem>>, vector<1x128xf32>
    %c0_17 = arith.constant 0 : index
    %c0_18 = arith.constant 0 : index
    %31 = vector.load %arg7[%c0_17, %c0_18] : memref<128x128xbf16, #tpu.memory_space<vmem>>, vector<128x128xbf16>
    %c0_19 = arith.constant 0 : index
    %c0_20 = arith.constant 0 : index
    %32 = vector.load %arg8[%c0_19, %c0_20] : memref<1x128xf32, #tpu.memory_space<vmem>>, vector<1x128xf32>
    %c0_21 = arith.constant 0 : index
    %c0_22 = arith.constant 0 : index
    %33 = vector.load %arg9[%c0_21, %c0_22] : memref<128x128xbf16, #tpu.memory_space<vmem>>, vector<128x128xbf16>
    %c0_23 = arith.constant 0 : index
    %c0_24 = arith.constant 0 : index
    %34 = vector.load %arg10[%c0_23, %c0_24] : memref<1x128xf32, #tpu.memory_space<vmem>>, vector<1x128xf32>
    %35 = arith.truncf %28 : vector<8x128xf32> to vector<8x128xbf16>
    %cst_25 = arith.constant dense<0.000000e+00> : vector<8x128xf32>
    %36 = tpu.matmul %35, %29, %cst_25 {dimension_numbers = #tpu.dot_dimension_numbers<[1], [0], [0], [1], [0, 0, 1, 1], [], []>} : vector<8x128xbf16>, vector<128x128xbf16>, vector<8x128xf32> -> vector<8x128xf32>
    %37 = vector.broadcast %30 : vector<1x128xf32> to vector<8x128xf32>
    %38 = arith.addf %36, %37 : vector<8x128xf32>
    %cst_26 = arith.constant 0.000000e+00 : f32
    %39 = vector.broadcast %cst_26 : f32 to vector<8x128xf32>
    %40 = arith.maximumf %38, %39 : vector<8x128xf32>
    %41 = arith.truncf %40 : vector<8x128xf32> to vector<8x128xbf16>
    %cst_27 = arith.constant dense<0.000000e+00> : vector<8x128xf32>
    %42 = tpu.matmul %41, %31, %cst_27 {dimension_numbers = #tpu.dot_dimension_numbers<[1], [0], [0], [1], [0, 0, 1, 1], [], []>} : vector<8x128xbf16>, vector<128x128xbf16>, vector<8x128xf32> -> vector<8x128xf32>
    %43 = vector.broadcast %32 : vector<1x128xf32> to vector<8x128xf32>
    %44 = arith.addf %42, %43 : vector<8x128xf32>
    %cst_28 = arith.constant 0.000000e+00 : f32
    %45 = vector.broadcast %cst_28 : f32 to vector<8x128xf32>
    %46 = arith.maximumf %44, %45 : vector<8x128xf32>
    %47 = arith.truncf %46 : vector<8x128xf32> to vector<8x128xbf16>
    %cst_29 = arith.constant dense<0.000000e+00> : vector<8x128xf32>
    %48 = tpu.matmul %47, %33, %cst_29 {dimension_numbers = #tpu.dot_dimension_numbers<[1], [0], [0], [1], [0, 0, 1, 1], [], []>} : vector<8x128xbf16>, vector<128x128xbf16>, vector<8x128xf32> -> vector<8x128xf32>
    %49 = vector.broadcast %34 : vector<1x128xf32> to vector<8x128xf32>
    %50 = arith.addf %48, %49 : vector<8x128xf32>
    %cst_30 = arith.constant dense<0xFF800000> : vector<8xf32>
    %51 = vector.multi_reduction <maximumf>, %50, %cst_30 [1] : vector<8x128xf32> to vector<8xf32>
    %52 = vector.shape_cast %51 : vector<8xf32> to vector<8x1xf32>
    %53 = vector.broadcast %52 : vector<8x1xf32> to vector<8x128xf32>
    %54 = arith.subf %50, %53 : vector<8x128xf32>
    %55 = math.exp %54 : vector<8x128xf32>
    %cst_31 = arith.constant dense<0.000000e+00> : vector<8xf32>
    %56 = vector.multi_reduction <add>, %55, %cst_31 [1] : vector<8x128xf32> to vector<8xf32>
    %57 = vector.shape_cast %56 : vector<8xf32> to vector<8x1xf32>
    %58 = vector.broadcast %57 : vector<8x1xf32> to vector<8x128xf32>
    %59 = arith.divf %55, %58 : vector<8x128xf32>
    %c0_32 = arith.constant 0 : index
    %c0_33 = arith.constant 0 : index
    %60 = vector.load %arg11[%c0_32, %c0_33] : memref<8x128xf32, #tpu.memory_space<vmem>>, vector<8x128xf32>
    tpu.vector_store %arg11[%c0_32, %c0_33], %59 {strides = array<i32>} : memref<8x128xf32, #tpu.memory_space<vmem>>, vector<8x128xf32>,
    return
  }
  func.func @transform_0(%arg0: i32) -> (i32, i32) {
    %c0_i32 = arith.constant 0 : i32
    %c0_i32_0 = arith.constant 0 : i32
    %c0_i32_1 = arith.constant 0 : i32
    return %c0_i32, %c0_i32_0 : i32, i32
  }
  func.func @transform_1(%arg0: i32) -> (i32, i32) {
    %c0_i32 = arith.constant 0 : i32
    %c0_i32_0 = arith.constant 0 : i32
    %c0_i32_1 = arith.constant 0 : i32
    return %c0_i32, %c0_i32_0 : i32, i32
  }
  func.func @transform_2(%arg0: i32) -> (i32, i32) {
    %c0_i32 = arith.constant 0 : i32
    %c0_i32_0 = arith.constant 0 : i32
    %c0_i32_1 = arith.constant 0 : i32
    return %c0_i32, %c0_i32_0 : i32, i32
  }
  func.func @transform_3(%arg0: i32) -> (i32, i32) {
    %c0_i32 = arith.constant 0 : i32
    %c0_i32_0 = arith.constant 0 : i32
    %c0_i32_1 = arith.constant 0 : i32
    return %c0_i32, %c0_i32_0 : i32, i32
  }
  func.func @transform_4(%arg0: i32) -> (i32, i32) {
    %c0_i32 = arith.constant 0 : i32
    %c0_i32_0 = arith.constant 0 : i32
    %c0_i32_1 = arith.constant 0 : i32
    return %c0_i32, %c0_i32_0 : i32, i32
  }
  func.func @transform_5(%arg0: i32) -> (i32, i32) {
    %c0_i32 = arith.constant 0 : i32
    %c0_i32_0 = arith.constant 0 : i32
    %c0_i32_1 = arith.constant 0 : i32
    return %c0_i32, %c0_i32_0 : i32, i32
  }
  func.func @transform_6(%arg0: i32) -> (i32, i32) {
    %c0_i32 = arith.constant 0 : i32
    %c0_i32_0 = arith.constant 0 : i32
    %c0_i32_1 = arith.constant 0 : i32
    return %c0_i32, %c0_i32_0 : i32, i32
  }
  func.func @transform_7(%arg0: i32) -> (i32, i32) {
    %c0_i32 = arith.constant 0 : i32
    %c0_i32_0 = arith.constant 0 : i32
    %c0_i32_1 = arith.constant 0 : i32
    return %c0_i32, %c0_i32_0 : i32, i32
  }
  func.func @transform_8(%arg0: i32) -> (i32, i32) {
    %c0_i32 = arith.constant 0 : i32
    %c0_i32_0 = arith.constant 0 : i32
    %c0_i32_1 = arith.constant 0 : i32
    return %c0_i32, %c0_i32_0 : i32, i32
  }
  func.func @transform_9(%arg0: i32) -> (i32, i32) {
    %c0_i32 = arith.constant 0 : i32
    %c0_i32_0 = arith.constant 0 : i32
    %c0_i32_1 = arith.constant 0 : i32
    return %c0_i32, %c0_i32_0 : i32, i32
  }
  func.func @transform_10(%arg0: i32) -> (i32, i32) {
    %c0_i32 = arith.constant 0 : i32
    %c0_i32_0 = arith.constant 0 : i32
    %c0_i32_1 = arith.constant 0 : i32
    return %c0_i32, %c0_i32_0 : i32, i32
  }
}

</mosaic_0001>

<bundles_post_ra>
// kernel: combined_classifier_forward.1
= control target key start
LH: loop header
LB: loop body
LE: loop exit
PB: predicated region body
PF: predicated region fallthrough
CT: control target
= control target key end

     0   :  { %15 = vsyncpa [#allocation3], 0  ;;  %s1077_s0 = inlined_call_operand.vmem [shape: f32[8,128], index: 0, kind: input, shape index: {}]   ;;  %s1078_s1 = inlined_call_operand.hbm [shape: bf16[128,128], index: 1, kind: input, shape index: {}]   ;;  %s1079_s2 = inlined_call_operand.vmem [shape: f32[1,128], index: 2, kind: input, shape index: {}]   ;;  %s1080_s3 = inlined_call_operand.vmem [shape: f32[1,128], index: 3, kind: input, shape index: {}]   ;;  %s1081_s4 = inlined_call_operand.hbm [shape: bf16[128,128], index: 4, kind: input, shape index: {}]   ;;  %s1082_s5 = inlined_call_operand.vmem [shape: f32[1,128], index: 5, kind: input, shape index: {}]   ;;  %s1083_s6 = inlined_call_operand.hbm [shape: bf16[128,128], index: 6, kind: input, shape index: {}]   ;;  %s1084_s7 = inlined_call_operand.vmem [shape: f32[1,128], index: 7, kind: input, shape index: {}]   ;;  %s1085_s8 = inlined_call_operand.hbm [shape: bf16[128,128], index: 8, kind: input, shape index: {}]   ;;  %s1086_s9 = inlined_call_operand.vmem [shape: f32[1,128], index: 9, kind: input, shape index: {}]   ;;  %s1087_s10 = inlined_call_operand.vmem [shape: f32[8,128], index: 10, kind: output, shape index: {}]  }
   0x1   :  { %16 = vsyncpa [#allocation5], 0 }
   0x2   :  { %17 = vsyncpa [#allocation8], 0  ;;  %s879_s13 = smov [#allocation4]   ;;  %s880_s15 = smov [#allocation2]  }
   0x3   :  { %s41_s14 = sshll.u32 %s879_s13, 4  ;;  %s25_s16 = sshll.u32 %s880_s15, 4  ;;  %s42_s14 = int_to_ptr.vmem [resolvable:$true] %s41_s14  ;;  %s942_s16 = int_to_ptr.vmem [resolvable:$true] %s25_s16 }
   0x4   :  { %s785_s19 = scalar_lea.hbm %s1081_s4, 1024 }
   0x5   :  { %p786_p0 = scmp.ne.s32.totalorder %s1081_s4, %s785_s19  ;;  %p789_p1 = scmp.lt.u32.totalorder %s785_s19, %s1081_s4 }
   0x7   :  { %p791_p2 = pnand %p789_p1, %p786_p0 }
   0x9   :  { %794 = shalt.err (!%p791_p2)
}
   0xa   :  { %s795_s24 = scalar_lea.vmem %s42_s14, 1024  ;;  %p800_p4 = scmp.lt.s32.totalorder %s42_s14, %s42_s14 }
   0xb   :  { %p796_p3 = scmp.ne.s32.totalorder %s42_s14, %s795_s24  ;;  %p801_p5 = scmp.lt.s32.totalorder %s795_s24, %s795_s24 }
   0xd   :  { %p802_p6 = por %p801_p5, %p800_p4 }
   0xf   :  { %p803_p7 = pnand %p802_p6, %p796_p3 }
  0x11   :  { %806 = shalt.err (!%p803_p7)
}
  0x12   :  { %s881_s25 = smov 64   ;;  %s882_s26 = smov 4  }
  0x13   :  { %47 = dma.hbm_to_vmem [thread:$0]  %s1081_s4, 1024, %s42_s14, [#allocation5], %s881_s25, %s881_s25, %s882_s26  }
  0x14   :  { %s807_s11 = scalar_lea.hbm %s1078_s1, 1024 }
  0x15   :  { %p808_p8 = scmp.ne.s32.totalorder %s1078_s1, %s807_s11  ;;  %p811_p9 = scmp.lt.u32.totalorder %s807_s11, %s1078_s1 }
  0x17   :  { %p813_p10 = pnand %p811_p9, %p808_p8 }
  0x19   :  { %816 = shalt.err (!%p813_p10)
}
  0x1a   :  { %s817_s18 = scalar_lea.vmem %s942_s16, 1024  ;;  %p822_p12 = scmp.lt.s32.totalorder %s942_s16, %s942_s16 }
  0x1b   :  { %p818_p11 = scmp.ne.s32.totalorder %s942_s16, %s817_s18  ;;  %p823_p13 = scmp.lt.s32.totalorder %s817_s18, %s817_s18 }
  0x1d   :  { %p824_p0 = por %p823_p13, %p822_p12 }
  0x1f   :  { %p825_p1 = pnand %p824_p0, %p818_p11 }
  0x21   :  { %828 = shalt.err (!%p825_p1)
}
  0x22   :  { %31 = dma.hbm_to_vmem [thread:$0]  %s1078_s1, 1024, %s942_s16, [#allocation3], %s881_s25, %s881_s25, %s882_s26  }
  0x23   :  { %s883_s19 = smov [#allocation6]   ;;  %s884_s21 = smov [#allocation7]  }
  0x24   :  { %s55_s20 = sshll.u32 %s883_s19, 4  ;;  %s69_s22 = sshll.u32 %s884_s21, 4  ;;  %s56_s20 = int_to_ptr.vmem [resolvable:$true] %s55_s20  ;;  %s979_s22 = int_to_ptr.vmem [resolvable:$true] %s69_s22 }
  0x25   :  { %s829_s27 = scalar_lea.hbm %s1083_s6, 1024 }
  0x26   :  { %p830_p2 = scmp.ne.s32.totalorder %s1083_s6, %s829_s27  ;;  %p833_p3 = scmp.lt.u32.totalorder %s829_s27, %s1083_s6 }
  0x28   :  { %p835_p4 = pnand %p833_p3, %p830_p2 }
  0x2a   :  { %838 = shalt.err (!%p835_p4)
}
  0x2b   :  { %s839_s1 = scalar_lea.vmem %s56_s20, 1024  ;;  %p844_p6 = scmp.lt.s32.totalorder %s56_s20, %s56_s20 }
  0x2c   :  { %p840_p5 = scmp.ne.s32.totalorder %s56_s20, %s839_s1  ;;  %p845_p7 = scmp.lt.s32.totalorder %s839_s1, %s839_s1 }
  0x2e   :  { %p846_p8 = por %p845_p7, %p844_p6 }
  0x30   :  { %p847_p9 = pnand %p846_p8, %p840_p5 }
  0x32   :  { %850 = shalt.err (!%p847_p9)
}
  0x33   :  { %61 = dma.hbm_to_vmem [thread:$0]  %s1083_s6, 1024, %s56_s20, [#allocation5], %s881_s25, %s881_s25, %s882_s26  }
  0x34   :  { %s851_s17 = scalar_lea.hbm %s1085_s8, 1024 }
  0x35   :  { %p852_p10 = scmp.ne.s32.totalorder %s1085_s8, %s851_s17  ;;  %p855_p11 = scmp.lt.u32.totalorder %s851_s17, %s1085_s8 }
  0x37   :  { %p857_p12 = pnand %p855_p11, %p852_p10 }
  0x39   :  { %860 = shalt.err (!%p857_p12)
}
  0x3a   :  { %s861_s21 = scalar_lea.vmem %s979_s22, 1024  ;;  %p866_p0 = scmp.lt.s32.totalorder %s979_s22, %s979_s22 }
  0x3b   :  { %p862_p13 = scmp.ne.s32.totalorder %s979_s22, %s861_s21  ;;  %p867_p1 = scmp.lt.s32.totalorder %s861_s21, %s861_s21 }
  0x3d   :  { %p868_p2 = por %p867_p1, %p866_p0 }
  0x3f   :  { %p869_p3 = pnand %p868_p2, %p862_p13 }
  0x41   :  { %872 = shalt.err (!%p869_p3)
}
  0x42   :  { %75 = dma.hbm_to_vmem [thread:$0]  %s1085_s8, 1024, %s979_s22, [#allocation8], %s881_s25, %s881_s25, %s882_s26  }
  0x43   :  { %873 = dma.done.wait [#allocation3], 1024  }
  0x44   :  { %874 = vsyncadd [#allocation3], 4294966272 }
  0x45   :  { %875 = dma.done.wait [#allocation5], 2048  }
  0x46   :  { %876 = vsyncadd [#allocation5], 4294965248 }
  0x47   :  { %877 = dma.done.wait [#allocation8], 1024  }
  0x48   :  { %878 = vsyncadd [#allocation8], 4294966272  ;;  %v885_v0 = vmov 0.0   ;;  %vm886_vm0 = vmmov 0   ;;  %v747_v1 = vld [vmem:[#allocation2] sm:$0xff]   ;;  %v748_v2 = vld [vmem:[#allocation2 + $0x8] sm:$0xff]   ;;  %v220_v46 = vlaneseq }
  0x49   :  { %659 = vmatprep.subr.bf16.mxu0 %v885_v0  ;;  %675 = vmatprep.mubr.msk.bf16.mxu0 %vm886_vm0, %v885_v0  ;;  %v749_v3 = vld [vmem:[#allocation2 + $0x10] sm:$0xff]   ;;  %v750_v4 = vld [vmem:[#allocation2 + $0x18] sm:$0xff]   ;;  %v751_v5 = vld [vmem:[#allocation2 + $0x20] sm:$0xff]  }
  0x4a   :  { %679 = vmatprep.subr.bf16.mxu1 %v885_v0  ;;  %695 = vmatprep.mubr.msk.bf16.mxu1 %vm886_vm0, %v885_v0  ;;  %v752_v6 = vld [vmem:[#allocation2 + $0x28] sm:$0xff]   ;;  %v753_v7 = vld [vmem:[#allocation2 + $0x30] sm:$0xff]   ;;  %v754_v8 = vld [vmem:[#allocation2 + $0x38] sm:$0xff]   ;;  %v221_v47 = vshrl.u32 %v220_v46, 7 }
  0x4b   :  { %660 = vmatpush3.bf16.msra.mxu0 %v747_v1  ;;  %v91_v9 = vld [vmem:[%s1077_s0] sm:$0xff]  ;;  %v756_v12 = vld [vmem:[#allocation4 + $0x8] sm:$0xff]   ;;  %v757_v13 = vld [vmem:[#allocation4 + $0x10] sm:$0xff]  }
  0x4c   :  { %661 = vmatprep.subr.bf16.mxu0 %v885_v0  ;;  %v92_v10 = vpack.c.bf16 %v91_v9, %v91_v9  ;;  %v755_v11 = vld [vmem:[#allocation4] sm:$0xff]   ;;  %v758_v14 = vld [vmem:[#allocation4 + $0x18] sm:$0xff]   ;;  %v760_v16 = vld [vmem:[#allocation4 + $0x28] sm:$0xff]   ;;  %v222_v49 = vsub.s32 0, %v221_v47 }
  0x4d   :  { %680 = vmatpush3.bf16.msra.mxu1 %v755_v11  ;;  %v759_v15 = vld [vmem:[#allocation4 + $0x20] sm:$0xff]   ;;  %v761_v17 = vld [vmem:[#allocation4 + $0x30] sm:$0xff]   ;;  %v762_v18 = vld [vmem:[#allocation4 + $0x38] sm:$0xff]  }
  0x4e   :  { %681 = vmatprep.subr.bf16.mxu1 %v885_v0  ;;  %v763_v19 = vld [vmem:[#allocation6] sm:$0xff]   ;;  %v764_v20 = vld [vmem:[#allocation6 + $0x8] sm:$0xff]   ;;  %v765_v21 = vld [vmem:[#allocation6 + $0x10] sm:$0xff]  }
  0x4f   :  { %662 = vmatpush3.bf16.msra.mxu0 %v748_v2  ;;  %v766_v22 = vld [vmem:[#allocation6 + $0x18] sm:$0xff]   ;;  %v767_v23 = vld [vmem:[#allocation6 + $0x20] sm:$0xff]   ;;  %v768_v24 = vld [vmem:[#allocation6 + $0x28] sm:$0xff]  }
  0x50   :  { %663 = vmatprep.subr.bf16.mxu0 %v885_v0  ;;  %v215_v48 = vld [vmem:[%s1079_s2] sm:$0x1]  ;;  %v769_v61 = vld [vmem:[#allocation6 + $0x30] sm:$0xff]   ;;  %v770_v62 = vld [vmem:[#allocation6 + $0x38] sm:$0xff]  }
  0x51   :  { %682 = vmatpush3.bf16.msra.mxu1 %v756_v12  ;;  %v217_v52 = vld [vmem:[%s1080_s3] sm:$0x1]  ;;  %v772_v1 = vld [vmem:[#allocation7 + $0x8] sm:$0xff]   ;;  %v773_v2 = vld [vmem:[#allocation7 + $0x10] sm:$0xff]  }
  0x52   :  { %683 = vmatprep.subr.bf16.mxu1 %v885_v0  ;;  %v771_v63 = vld [vmem:[#allocation7] sm:$0xff]  }
  0x53   :  { %664 = vmatpush3.bf16.msra.mxu0 %v749_v3  ;;  %v774_v3 = vld [vmem:[#allocation7 + $0x18] sm:$0xff]  }
  0x54   :  { %665 = vmatprep.subr.bf16.mxu0 %v885_v0 }
  0x55   :  { %684 = vmatpush3.bf16.msra.mxu1 %v757_v13 }
  0x56   :  { %685 = vmatprep.subr.bf16.mxu1 %v885_v0 }
  0x57   :  { %666 = vmatpush3.bf16.msra.mxu0 %v750_v4  ;;  %v775_v4 = vld [vmem:[#allocation7 + $0x20] sm:$0xff]  }
  0x58   :  { %667 = vmatprep.subr.bf16.mxu0 %v885_v0 }
  0x59   :  { %686 = vmatpush3.bf16.msra.mxu1 %v758_v14  ;;  %v777_v14 = vld [vmem:[#allocation7 + $0x30] sm:$0xff]  }
  0x5a   :  { %687 = vmatprep.subr.bf16.mxu1 %v885_v0 }
  0x5b   :  { %668 = vmatpush3.bf16.msra.mxu0 %v751_v5  ;;  %v776_v5 = vld [vmem:[#allocation7 + $0x28] sm:$0xff]  }
  0x5c   :  { %669 = vmatprep.subr.bf16.mxu0 %v885_v0 }
  0x5d   :  { %688 = vmatpush3.bf16.msra.mxu1 %v759_v15  ;;  %v778_v15 = vld [vmem:[#allocation7 + $0x38] sm:$0xff]  }
  0x5e   :  { %689 = vmatprep.subr.bf16.mxu1 %v885_v0 }
  0x5f   :  { %670 = vmatpush3.bf16.msra.mxu0 %v752_v6  ;;  %v596_v6 = vld [vmem:[%s1082_s5] ss:$0 sm:$0xff] }
  0x60   :  { %671 = vmatprep.subr.bf16.mxu0 %v885_v0 }
  0x61   :  { %690 = vmatpush3.bf16.msra.mxu1 %v760_v16  ;;  %v605_v16 = vld [vmem:[%s1084_s7] ss:$0 sm:$0xff] }
  0x62   :  { %691 = vmatprep.subr.bf16.mxu1 %v885_v0 }
  0x63   :  { %672 = vmatpush3.bf16.msra.mxu0 %v753_v7 }
  0x64   :  { %673 = vmatprep.subr.bf16.mxu0 %v885_v0 }
  0x65   :  { %692 = vmatpush3.bf16.msra.mxu1 %v761_v17 }
  0x66   :  { %693 = vmatprep.subr.bf16.mxu1 %v885_v0 }
  0x67   :  { %674 = vmatpush3.bf16.msra.mxu0 %v754_v8 }
  0x68   :  { %699 = vmatprep.subr.bf16.mxu0 %v885_v0 }
  0x69   :  { %694 = vmatpush3.bf16.msra.mxu1 %v762_v18 }
  0x6a   :  { %676 = vmatmul.mubr.bf16.vlgmr.msra.gmra.mrb[0].mxu0 %v92_v10  ;;  %719 = vmatprep.subr.bf16.mxu1 %v885_v0 }
  0x6b   :  { %715 = vmatprep.mubr.msk.bf16.mxu0 %vm886_vm0, %v885_v0  ;;  %700 = vmatpush3.bf16.msra.mxu0 %v763_v19 }
  0x6c   :  { %701 = vmatprep.subr.bf16.mxu0 %v885_v0 }
  0x6f   :  { %702 = vmatpush3.bf16.msra.mxu0 %v764_v20 }
  0x70   :  { %703 = vmatprep.subr.bf16.mxu0 %v885_v0 }
  0x73   :  { %704 = vmatpush3.bf16.msra.mxu0 %v765_v21 }
  0x74   :  { %705 = vmatprep.subr.bf16.mxu0 %v885_v0 }
  0x77   :  { %706 = vmatpush3.bf16.msra.mxu0 %v766_v22 }
  0x78   :  { %707 = vmatprep.subr.bf16.mxu0 %v885_v0 }
  0x7b   :  { %708 = vmatpush3.bf16.msra.mxu0 %v767_v23 }
  0x7c   :  { %709 = vmatprep.subr.bf16.mxu0 %v885_v0 }
  0x7f   :  { %710 = vmatpush3.bf16.msra.mxu0 %v768_v24  ;;  %v614_v24 = vld [vmem:[%s1086_s9] ss:$0 sm:$0xff] }
  0x80   :  { %711 = vmatprep.subr.bf16.mxu0 %v885_v0 }
  0x83   :  { %712 = vmatpush3.bf16.msra.mxu0 %v769_v61 }
  0x84   :  { %713 = vmatprep.subr.bf16.mxu0 %v885_v0 }
  0x87   :  { %714 = vmatpush3.bf16.msra.mxu0 %v770_v62 }
 0x13d   :  { %v191_v25 = vpop.f32.mrb[0].mxu0 }
 0x13e   :  { %v197_v26 = vrot.slane %v191_v25, 4  ;;  %v677_v27 = vpop.f32.mrb[1].mxu0 }
 0x13f   :  { %v194_v28 = vpop.f32.mrb[2].mxu0 }
 0x140   :  { %v198_v29 = vadd.f32 %v197_v26, %v191_v25  ;;  %v678_v30 = vpop.f32.mrb[3].mxu0 }
 0x142   :  { %v199_v31 = vrot.slane %v198_v29, 2 }
 0x144   :  { %v200_v32 = vadd.f32 %v199_v31, %v198_v29 }
 0x146   :  { %v201_v33 = vrot.slane %v200_v32, 1 }
 0x148   :  { %v202_v34 = vadd.f32 %v201_v33, %v200_v32 }
 0x14a   :  { %v203_v35 = vmul.f32 0.125, %v202_v34 }
 0x14c   :  { %v204_v36 = vsub.f32 %v191_v25, %v203_v35 }
 0x14e   :  { %v205_v37 = vmul.f32 %v204_v36, %v204_v36 }
 0x150   :  { %v206_v38 = vrot.slane %v205_v37, 4 }
 0x152   :  { %v207_v39 = vadd.f32 %v206_v38, %v205_v37 }
 0x154   :  { %v208_v40 = vrot.slane %v207_v39, 2 }
 0x156   :  { %v209_v41 = vadd.f32 %v208_v40, %v207_v39 }
 0x158   :  { %v210_v42 = vrot.slane %v209_v41, 1 }
 0x15a   :  { %v211_v43 = vadd.f32 %v210_v42, %v209_v41 }
 0x15c   :  { %v212_v44 = vmul.f32 0.125, %v211_v43 }
 0x15e   :  { %v213_v45 = vadd.f32 1e-05, %v212_v44 }
 0x160   :  { %779 = vrsqrt.f32 %v213_v45 }
 0x16a   :  { %v780_v50 = vpop.eup %779 }
 0x16b   :  { %v216_v51 = vmul.f32 %v780_v50, %v215_v48 }
 0x16d   :  { %v218_v53 = vmul.f32 %v216_v51, %v203_v35  ;;  %v223_v54 = vrot.slane %v216_v51, %v222_v49 }
 0x16f   :  { %v219_v55 = vsub.f32 %v217_v52, %v218_v53  ;;  %v224_v56 = vmul.f32 %v223_v54, %v191_v25 }
 0x171   :  { %v229_v57 = vrot.slane %v219_v55, %v222_v49 }
 0x173   :  { %v231_v58 = vadd.f32 %v229_v57, %v224_v56 }
 0x175   :  { %v232_v59 = vmax.f32 %v231_v58, 0.0 }
 0x177   :  { %v284_v60 = vpack.c.bf16 %v232_v59, %v232_v59 }
 0x179   :  { %696 = vmatmul.mubr.bf16.vlgmr.msra.gmra.mrb[0].mxu1 %v284_v60 }
 0x17a   :  { %735 = vmatprep.mubr.msk.bf16.mxu1 %vm886_vm0, %v885_v0  ;;  %720 = vmatpush3.bf16.msra.mxu1 %v771_v63 }
 0x17b   :  { %721 = vmatprep.subr.bf16.mxu1 %v885_v0 }
 0x17e   :  { %722 = vmatpush3.bf16.msra.mxu1 %v772_v1 }
 0x17f   :  { %723 = vmatprep.subr.bf16.mxu1 %v885_v0 }
 0x182   :  { %724 = vmatpush3.bf16.msra.mxu1 %v773_v2 }
 0x183   :  { %725 = vmatprep.subr.bf16.mxu1 %v885_v0 }
 0x186   :  { %726 = vmatpush3.bf16.msra.mxu1 %v774_v3 }
 0x187   :  { %727 = vmatprep.subr.bf16.mxu1 %v885_v0 }
 0x18a   :  { %728 = vmatpush3.bf16.msra.mxu1 %v775_v4 }
 0x18b   :  { %729 = vmatprep.subr.bf16.mxu1 %v885_v0 }
 0x18e   :  { %730 = vmatpush3.bf16.msra.mxu1 %v776_v5 }
 0x18f   :  { %731 = vmatprep.subr.bf16.mxu1 %v885_v0 }
 0x192   :  { %732 = vmatpush3.bf16.msra.mxu1 %v777_v14 }
 0x193   :  { %733 = vmatprep.subr.bf16.mxu1 %v885_v0 }
 0x196   :  { %734 = vmatpush3.bf16.msra.mxu1 %v778_v15 }
 0x24c   :  { %v373_v7 = vpop.f32.mrb[0].mxu1 }
 0x24d   :  { %v374_v8 = vadd.f32 %v596_v6, %v373_v7  ;;  %v697_v9 = vpop.f32.mrb[1].mxu1 }
 0x24e   :  { %v376_v10 = vpop.f32.mrb[2].mxu1 }
 0x24f   :  { %v379_v11 = vmax.f32 %v374_v8, 0.0  ;;  %v698_v12 = vpop.f32.mrb[3].mxu1 }
 0x251   :  { %v380_v13 = vpack.c.bf16 %v379_v11, %v379_v11 }
 0x253   :  { %716 = vmatmul.mubr.bf16.vlgmr.msra.gmra.mrb[4].mxu0 %v380_v13 }
 0x326   :  { %v469_v17 = vpop.f32.mrb[4].mxu0 }
 0x327   :  { %v470_v18 = vadd.f32 %v605_v16, %v469_v17  ;;  %v717_v19 = vpop.f32.mrb[5].mxu0 }
 0x328   :  { %v472_v20 = vpop.f32.mrb[6].mxu0 }
 0x329   :  { %v475_v21 = vmax.f32 %v470_v18, 0.0  ;;  %v718_v22 = vpop.f32.mrb[7].mxu0 }
 0x32b   :  { %v476_v23 = vpack.c.bf16 %v475_v21, %v475_v21 }
 0x32d   :  { %736 = vmatmul.mubr.bf16.vlgmr.msra.gmra.mrb[4].mxu1 %v476_v23 }
 0x400   :  { %v565_v25 = vpop.f32.mrb[4].mxu1 }
 0x401   :  { %v566_v0 = vadd.f32 %v614_v24, %v565_v25  ;;  %v737_v26 = vpop.f32.mrb[5].mxu1 }
 0x402   :  { %v568_v27 = vpop.f32.mrb[6].mxu1 }
 0x403   :  { %571 = vmax.xlane.f32.xlu0 %v566_v0  ;;  %v738_v28 = vpop.f32.mrb[7].mxu1 }
 0x490   :  { %v572_v29 = vpop.xlane.xlu0 %571 }
 0x491   :  { %v573_v30 = vsub.f32 %v566_v0, %v572_v29 }
 0x493   :  { %v574_v31 = vmul.f32 1.442695, %v573_v30 }
 0x495   :  { %781 = vpow2.f32 %v574_v31 }
 0x49f   :  { %v782_v32 = vpop.eup %781 }
 0x4a0   :  { %576 = vadd.xlane.f32.xlu0 %v782_v32 }
 0x52d   :  { %v577_v33 = vpop.xlane.xlu0 %576 }
 0x52e   :  { %783 = vrcp.f32 %v577_v33 }
 0x538   :  { %v784_v34 = vpop.eup %783 }
 0x539   :  { %v579_v35 = vmul.f32 %v784_v34, %v782_v32 }
 0x53b   :  { %580 = vst [vmem:[%s1087_s10] sm:$0xff] %v579_v35 }
 0x53c   :  { %585 = vsyncpa [#allocation3], 1 }
 0x53d   :  { %586 = vsyncpa [#allocation5], 1 }
 0x53e   :  { %587 = vsyncpa [#allocation8], 1 }

</bundles_post_ra>
